<compile_context>
chip_gen: v5e
topology: v5e:2x2
jax: 0.10.0
libtpu: 0.0.40
codegen_flags: <defaults>
</compile_context>

<pallas_src>
import functools

import jax
import jax.numpy as jnp
from jax.experimental import pallas as pl
from jax.experimental.pallas import tpu as pltpu


_NEG_SLOPE = 0.01                      # nn.LeakyReLU() default negative slope
_VMEM_LIMIT_BYTES = 48 * 1024 * 1024   # comfortably under v7x's 64 MiB physical VMEM


def _round_up(n, m):
    return ((n + m - 1) // m) * m


def _leaky_relu(v):
    return jnp.where(v > 0, v, _NEG_SLOPE * v)


# ---------------------------------------------------------------------------
# Kernel bodies
# ---------------------------------------------------------------------------
def _dagan_chain(x, noise, w_refs, b_ref, out_dims, compute_dtype):
    """encoder -> +noise -> decoder on one (tb, .) activation tile (f32 accum)."""
    def linear(v, w_ref, row, n_out):
        acc = jnp.dot(v.astype(compute_dtype), w_ref[...],
                      preferred_element_type=jnp.float32)
        return acc + b_ref[row:row + 1, :n_out]          # (1, n_out) broadcast

    e, _, h_dim, d, _, out_pad = out_dims
    h = _leaky_relu(linear(x, w_refs[0], 0, e))
    h = _leaky_relu(linear(h, w_refs[1], 1, e))
    z = linear(h, w_refs[2], 2, h_dim) + noise
    o = _leaky_relu(linear(z, w_refs[3], 3, d))
    o = _leaky_relu(linear(o, w_refs[4], 4, d))
    return linear(o, w_refs[5], 5, out_pad)


def _kernel_rng_noise(seed_ref, x_ref, w1, w2, w3, w4, w5, w6, b_ref, o_ref,
                      *, out_dims, noise_dim, compute_dtype):
    # Per-tile seed so every batch tile draws independent N(0,1) noise
    # (the RNG runs on VPU/EUP slots that are idle during the MXU chain).
    pltpu.prng_seed(seed_ref[0] + pl.program_id(0))
    noise = pltpu.stateful_normal((x_ref.shape[0], noise_dim), jnp.float32)
    out = _dagan_chain(x_ref[...].astype(jnp.float32), noise,
                       (w1, w2, w3, w4, w5, w6), b_ref, out_dims, compute_dtype)
    o_ref[...] = out.astype(o_ref.dtype)


def _kernel_ext_noise(x_ref, noise_ref, w1, w2, w3, w4, w5, w6, b_ref, o_ref,
                      *, out_dims, compute_dtype):
    out = _dagan_chain(x_ref[...].astype(jnp.float32),
                       noise_ref[...].astype(jnp.float32),
                       (w1, w2, w3, w4, w5, w6), b_ref, out_dims, compute_dtype)
    o_ref[...] = out.astype(o_ref.dtype)


# ---------------------------------------------------------------------------
# Wrapper
# ---------------------------------------------------------------------------
def _default_batch_tile(b):
    # Target >=2 grid steps (pipelining + v7x megacore) while amortizing the
    # ~0.35us per-step overhead; always a multiple of 8 sublanes, <=512 rows.
    half = (b + 1) // 2
    return max(8, min(512, _round_up(half, 8)))


def augmentation_generator_forward(x, params, *, noise=None, seed=0,
                                   batch_tile=None,
                                   weight_dtype=jnp.bfloat16):
    """Fused DAGAN-generator forward.

    x      : (B, history_len, input_dim) float array
    params : (w1,b1, ..., w6,b6), weights stored (in_features, out_features)
    noise  : optional (B, hidden_noise_dim) gaussian noise. If None, noise is
             drawn on-chip from the TPU PRNG (torch.normal equivalent).
    Returns (B, 1, input_dim), matching the PyTorch module.
    """
    (w1, b1, w2, b2, w3, b3, w4, b4, w5, b5, w6, b6) = params
    b = x.shape[0]
    din, e = w1.shape
    h_dim = w3.shape[1]
    d = w4.shape[1]
    input_dim = w6.shape[1]

    x_flat = x.reshape(b, din).astype(jnp.float32)        # glue reshape

    tb = batch_tile if batch_tile is not None else _default_batch_tile(b)
    n_tiles = pl.cdiv(b, tb)
    b_padded = n_tiles * tb
    if b_padded != b:
        x_flat = jnp.pad(x_flat, ((0, b_padded - b), (0, 0)))

    # Lane-dense output slab: pad the last layer to a multiple of 128 lanes.
    out_pad = _round_up(input_dim, 128)
    w6p = jnp.pad(w6, ((0, 0), (0, out_pad - input_dim)))

    weights = tuple(w.astype(weight_dtype) for w in (w1, w2, w3, w4, w5, w6p))

    # Pack the six bias vectors into a single resident (6, BMAX) f32 array.
    out_dims = (e, e, h_dim, d, d, out_pad)
    bmax = _round_up(max(out_dims), 128)
    b_all = jnp.zeros((6, bmax), jnp.float32)
    for row, vec in enumerate((b1, b2, b3, b4, b5, b6)):
        b_all = b_all.at[row, :vec.size].set(
            vec.reshape(-1).astype(jnp.float32))

    if noise is not None:
        noise_arr = jnp.asarray(noise, jnp.float32)
        if b_padded != b:
            noise_arr = jnp.pad(noise_arr, ((0, b_padded - b), (0, 0)))
    else:
        noise_arr = None

    flops = 2 * b_padded * (din * e + e * e + e * h_dim
                            + h_dim * d + d * d + d * out_pad)

    def _run(noise_operand, single_buffer_weights):
        with_seed = noise_operand is None

        if with_seed:                       # scalar-prefetch ref trails index_map args
            tile_map = lambda i, s: (i, 0)
            const_map = lambda i, s: (0, 0)
        else:
            tile_map = lambda i: (i, 0)
            const_map = lambda i: (0, 0)

        def resident(shape):
            if single_buffer_weights:
                # Grid-invariant operand: one VMEM buffer is enough.
                return pl.BlockSpec(shape, const_map,
                                    pipeline_mode=pl.Buffered(1))
            return pl.BlockSpec(shape, const_map)

        in_specs = [pl.BlockSpec((tb, din), tile_map)]
        operands = [x_flat]
        if not with_seed:
            in_specs.append(pl.BlockSpec((tb, h_dim), tile_map))
            operands.append(noise_operand)
        in_specs += [resident(w.shape) for w in weights]
        in_specs.append(resident(b_all.shape))
        operands += list(weights) + [b_all]

        if with_seed:
            kernel = functools.partial(_kernel_rng_noise, out_dims=out_dims,
                                       noise_dim=h_dim,
                                       compute_dtype=weight_dtype)
            call_args = (jnp.asarray([seed], jnp.int32), *operands)
        else:
            kernel = functools.partial(_kernel_ext_noise, out_dims=out_dims,
                                       compute_dtype=weight_dtype)
            call_args = tuple(operands)

        bytes_accessed = int(sum(a.size * a.dtype.itemsize for a in operands)
                             + b_padded * out_pad * 4)

        grid_spec = pltpu.PrefetchScalarGridSpec(
            num_scalar_prefetch=1 if with_seed else 0,
            grid=(n_tiles,),
            in_specs=in_specs,
            out_specs=pl.BlockSpec((tb, out_pad), tile_map),
        )
        return pl.pallas_call(
            kernel,
            out_shape=jax.ShapeDtypeStruct((b_padded, out_pad), jnp.float32),
            grid_spec=grid_spec,
            compiler_params=pltpu.CompilerParams(
                dimension_semantics=("parallel",),
                vmem_limit_bytes=_VMEM_LIMIT_BYTES),
            cost_estimate=pl.CostEstimate(flops=flops, transcendentals=0,
                                          bytes_accessed=bytes_accessed),
        )(*call_args)

    try:
        out = _run(noise_arr, single_buffer_weights=True)
    except Exception:
        # Conservative fallback for older jaxlib (no pipeline_mode / stateful
        # PRNG): host-side noise + default double-buffered weight specs.
        fb_noise = noise_arr
        if fb_noise is None:
            fb_noise = jax.random.normal(jax.random.PRNGKey(seed),
                                         (b_padded, h_dim), jnp.float32)
        out = _run(fb_noise, single_buffer_weights=False)

    # reshape(batch, input_dim).unsqueeze(1), dropping batch / lane padding
    return out[:b, :input_dim][:, None, :]


# ---------------------------------------------------------------------------
# Parameter init + pure-JAX reference
# ---------------------------------------------------------------------------
def init_params(key, input_dim, hidden_noise_dim, history_len,
                encoder_dim, decoder_dim):
    """PyTorch-nn.Linear-style init; weights stored (in_features, out_features)."""
    dims = [
        (input_dim * history_len, encoder_dim),
        (encoder_dim, encoder_dim),
        (encoder_dim, hidden_noise_dim),
        (hidden_noise_dim, decoder_dim),
        (decoder_dim, decoder_dim),
        (decoder_dim, input_dim),
    ]
    params = []
    for fan_in, fan_out in dims:
        key, kw, kb = jax.random.split(key, 3)
        bound = 1.0 / jnp.sqrt(fan_in)
        w = jax.random.uniform(kw, (fan_in, fan_out), jnp.float32, -bound, bound)
        bvec = jax.random.uniform(kb, (1, fan_out), jnp.float32, -bound, bound)
        params += [w, bvec]
    return tuple(params)


def reference_forward(x, noise, params, *, weight_dtype=jnp.float32):
    """Pure-JAX reference matching the PyTorch forward (explicit noise)."""
    (w1, b1, w2, b2, w3, b3, w4, b4, w5, b5, w6, b6) = params
    lrelu = lambda v: jnp.where(v > 0, v, _NEG_SLOPE * v)

    def lin(v, w, bias):
        return jnp.dot(v.astype(weight_dtype), w.astype(weight_dtype),
                       preferred_element_type=jnp.float32) + bias

    b = x.shape[0]
    h = x.reshape(b, w1.shape[0]).astype(jnp.float32)
    h = lrelu(lin(h, w1, b1))
    h = lrelu(lin(h, w2, b2))
    z = lin(h, w3, b3) + noise
    dd = lrelu(lin(z, w4, b4))
    dd = lrelu(lin(dd, w5, b5))
    out = lin(dd, w6, b6)
    return out[:, None, :]


# ---------------------------------------------------------------------------
# Demo / self-test
# ---------------------------------------------------------------------------
if __name__ == "__main__":
    input_dim = 8
    history_len = 4
    hidden_noise_dim = 16
    encoder_dim = 32
    decoder_dim = 32
    batch = 13          # deliberately ragged: padded to 2 tiles of 8 rows

    key = jax.random.PRNGKey(0)
    key, kx, kn, kp = jax.random.split(key, 4)

    x = jax.random.normal(kx, (batch, history_len, input_dim), jnp.float32)
    noise = jax.random.normal(kn, (batch, hidden_noise_dim), jnp.float32)
    params = init_params(kp, input_dim, hidden_noise_dim, history_len,
                         encoder_dim, decoder_dim)

    # 1) explicit-noise / f32-weight path: exact check against the reference.
    out_f32 = jax.block_until_ready(
        augmentation_generator_forward(x, params, noise=noise,
                                       weight_dtype=jnp.float32))
    ref_f32 = reference_forward(x, noise, params, weight_dtype=jnp.float32)
    assert out_f32.shape == (batch, 1, input_dim), out_f32.shape
    assert jnp.allclose(out_f32, ref_f32, atol=1e-5, rtol=1e-5), \
        float(jnp.max(jnp.abs(out_f32 - ref_f32)))

    # 2) bf16-weight (default production dtype) path vs. a reference quantized
    #    the same way: loose tolerance.
    out_bf16 = jax.block_until_ready(
        augmentation_generator_forward(x, params, noise=noise,
                                       weight_dtype=jnp.bfloat16))
    ref_bf16 = reference_forward(x, noise, params, weight_dtype=jnp.bfloat16)
    assert jnp.allclose(out_bf16, ref_bf16, atol=5e-2, rtol=5e-2), \
        float(jnp.max(jnp.abs(out_bf16 - ref_bf16)))

    # 3) production path: gaussian noise drawn on-chip (torch.normal equivalent).
    out_rng = jax.block_until_ready(
        augmentation_generator_forward(x, params, seed=1234))
    assert out_rng.shape == (batch, 1, input_dim), out_rng.shape
    assert bool(jnp.all(jnp.isfinite(out_rng)))

    print("KERNEL_OK")
</pallas_src>

<mosaic_0001>
module attributes {stable_mosaic.version = 11 : i64} {
  func.func @_kernel_ext_noise(%arg0: i32, %arg1: memref<8x32xf32, #tpu.memory_space<vmem>>, %arg2: memref<8x16xf32, #tpu.memory_space<vmem>>, %arg3: memref<32x32xf32, #tpu.memory_space<vmem>>, %arg4: memref<32x32xf32, #tpu.memory_space<vmem>>, %arg5: memref<32x16xf32, #tpu.memory_space<vmem>>, %arg6: memref<16x32xf32, #tpu.memory_space<vmem>>, %arg7: memref<32x32xf32, #tpu.memory_space<vmem>>, %arg8: memref<32x128xf32, #tpu.memory_space<vmem>>, %arg9: memref<6x128xf32, #tpu.memory_space<vmem>>, %arg10: memref<8x128xf32, #tpu.memory_space<vmem>>) attributes {dimension_semantics = [#tpu.dimension_semantics<parallel>], iteration_bounds = array<i64: 2>, scalar_prefetch = 0 : i64, scratch_operands = 0 : i64, tpu.core_type = #tpu.core_type<tc>, window_params = [{transform_indices = @transform_0, window_bounds = array<i64: 8, 32>}, {transform_indices = @transform_1, window_bounds = array<i64: 8, 16>}, {pipeline_mode = #tpu.pipeline_mode<synchronous>, transform_indices = @transform_2, window_bounds = array<i64: 32, 32>}, {pipeline_mode = #tpu.pipeline_mode<synchronous>, transform_indices = @transform_3, window_bounds = array<i64: 32, 32>}, {pipeline_mode = #tpu.pipeline_mode<synchronous>, transform_indices = @transform_4, window_bounds = array<i64: 32, 16>}, {pipeline_mode = #tpu.pipeline_mode<synchronous>, transform_indices = @transform_5, window_bounds = array<i64: 16, 32>}, {pipeline_mode = #tpu.pipeline_mode<synchronous>, transform_indices = @transform_6, window_bounds = array<i64: 32, 32>}, {pipeline_mode = #tpu.pipeline_mode<synchronous>, transform_indices = @transform_7, window_bounds = array<i64: 32, 128>}, {pipeline_mode = #tpu.pipeline_mode<synchronous>, transform_indices = @transform_8, window_bounds = array<i64: 6, 128>}, {transform_indices = @transform_9, window_bounds = array<i64: 8, 128>}]} {
    %c0 = arith.constant 0 : index
    %c0_0 = arith.constant 0 : index
    %0 = vector.load %arg1[%c0, %c0_0] : memref<8x32xf32, #tpu.memory_space<vmem>>, vector<8x32xf32>
    %c0_1 = arith.constant 0 : index
    %c0_2 = arith.constant 0 : index
    %1 = vector.load %arg2[%c0_1, %c0_2] : memref<8x16xf32, #tpu.memory_space<vmem>>, vector<8x16xf32>
    %c0_3 = arith.constant 0 : index
    %c0_4 = arith.constant 0 : index
    %2 = vector.load %arg3[%c0_3, %c0_4] : memref<32x32xf32, #tpu.memory_space<vmem>>, vector<32x32xf32>
    %cst = arith.constant dense<0.000000e+00> : vector<8x32xf32>
    %3 = tpu.matmul %0, %2, %cst {dimension_numbers = #tpu.dot_dimension_numbers<[1], [0], [0], [1], [0, 0, 1, 1], [], []>} : vector<8x32xf32>, vector<32x32xf32>, vector<8x32xf32> -> vector<8x32xf32>
    %c0_5 = arith.constant 0 : index
    %c0_6 = arith.constant 0 : index
    %4 = vector.load %arg9[%c0_5, %c0_6] : memref<6x128xf32, #tpu.memory_space<vmem>>, vector<1x32xf32>
    %5 = vector.broadcast %4 : vector<1x32xf32> to vector<8x32xf32>
    %6 = arith.addf %3, %5 : vector<8x32xf32>
    %cst_7 = arith.constant 0.000000e+00 : f32
    %7 = vector.broadcast %cst_7 : f32 to vector<8x32xf32>
    %8 = arith.cmpf ogt, %6, %7 : vector<8x32xf32>
    %cst_8 = arith.constant 0.00999999977 : f32
    %9 = vector.broadcast %cst_8 : f32 to vector<8x32xf32>
    %10 = arith.mulf %9, %6 : vector<8x32xf32>
    %11 = arith.select %8, %6, %10 : vector<8x32xi1>, vector<8x32xf32>
    %c0_9 = arith.constant 0 : index
    %c0_10 = arith.constant 0 : index
    %12 = vector.load %arg4[%c0_9, %c0_10] : memref<32x32xf32, #tpu.memory_space<vmem>>, vector<32x32xf32>
    %cst_11 = arith.constant dense<0.000000e+00> : vector<8x32xf32>
    %13 = tpu.matmul %11, %12, %cst_11 {dimension_numbers = #tpu.dot_dimension_numbers<[1], [0], [0], [1], [0, 0, 1, 1], [], []>} : vector<8x32xf32>, vector<32x32xf32>, vector<8x32xf32> -> vector<8x32xf32>
    %c1 = arith.constant 1 : index
    %c0_12 = arith.constant 0 : index
    %14 = vector.load %arg9[%c1, %c0_12] : memref<6x128xf32, #tpu.memory_space<vmem>>, vector<1x32xf32>
    %15 = vector.broadcast %14 : vector<1x32xf32> to vector<8x32xf32>
    %16 = arith.addf %13, %15 : vector<8x32xf32>
    %cst_13 = arith.constant 0.000000e+00 : f32
    %17 = vector.broadcast %cst_13 : f32 to vector<8x32xf32>
    %18 = arith.cmpf ogt, %16, %17 : vector<8x32xf32>
    %cst_14 = arith.constant 0.00999999977 : f32
    %19 = vector.broadcast %cst_14 : f32 to vector<8x32xf32>
    %20 = arith.mulf %19, %16 : vector<8x32xf32>
    %21 = arith.select %18, %16, %20 : vector<8x32xi1>, vector<8x32xf32>
    %c0_15 = arith.constant 0 : index
    %c0_16 = arith.constant 0 : index
    %22 = vector.load %arg5[%c0_15, %c0_16] : memref<32x16xf32, #tpu.memory_space<vmem>>, vector<32x16xf32>
    %cst_17 = arith.constant dense<0.000000e+00> : vector<8x16xf32>
    %23 = tpu.matmul %21, %22, %cst_17 {dimension_numbers = #tpu.dot_dimension_numbers<[1], [0], [0], [1], [0, 0, 1, 1], [], []>} : vector<8x32xf32>, vector<32x16xf32>, vector<8x16xf32> -> vector<8x16xf32>
    %c2 = arith.constant 2 : index
    %c0_18 = arith.constant 0 : index
    %24 = vector.load %arg9[%c2, %c0_18] : memref<6x128xf32, #tpu.memory_space<vmem>>, vector<1x16xf32>
    %25 = vector.broadcast %24 : vector<1x16xf32> to vector<8x16xf32>
    %26 = arith.addf %23, %25 : vector<8x16xf32>
    %27 = arith.addf %26, %1 : vector<8x16xf32>
    %c0_19 = arith.constant 0 : index
    %c0_20 = arith.constant 0 : index
    %28 = vector.load %arg6[%c0_19, %c0_20] : memref<16x32xf32, #tpu.memory_space<vmem>>, vector<16x32xf32>
    %cst_21 = arith.constant dense<0.000000e+00> : vector<8x32xf32>
    %29 = tpu.matmul %27, %28, %cst_21 {dimension_numbers = #tpu.dot_dimension_numbers<[1], [0], [0], [1], [0, 0, 1, 1], [], []>} : vector<8x16xf32>, vector<16x32xf32>, vector<8x32xf32> -> vector<8x32xf32>
    %c3 = arith.constant 3 : index
    %c0_22 = arith.constant 0 : index
    %30 = vector.load %arg9[%c3, %c0_22] : memref<6x128xf32, #tpu.memory_space<vmem>>, vector<1x32xf32>
    %31 = vector.broadcast %30 : vector<1x32xf32> to vector<8x32xf32>
    %32 = arith.addf %29, %31 : vector<8x32xf32>
    %cst_23 = arith.constant 0.000000e+00 : f32
    %33 = vector.broadcast %cst_23 : f32 to vector<8x32xf32>
    %34 = arith.cmpf ogt, %32, %33 : vector<8x32xf32>
    %cst_24 = arith.constant 0.00999999977 : f32
    %35 = vector.broadcast %cst_24 : f32 to vector<8x32xf32>
    %36 = arith.mulf %35, %32 : vector<8x32xf32>
    %37 = arith.select %34, %32, %36 : vector<8x32xi1>, vector<8x32xf32>
    %c0_25 = arith.constant 0 : index
    %c0_26 = arith.constant 0 : index
    %38 = vector.load %arg7[%c0_25, %c0_26] : memref<32x32xf32, #tpu.memory_space<vmem>>, vector<32x32xf32>
    %cst_27 = arith.constant dense<0.000000e+00> : vector<8x32xf32>
    %39 = tpu.matmul %37, %38, %cst_27 {dimension_numbers = #tpu.dot_dimension_numbers<[1], [0], [0], [1], [0, 0, 1, 1], [], []>} : vector<8x32xf32>, vector<32x32xf32>, vector<8x32xf32> -> vector<8x32xf32>
    %c4 = arith.constant 4 : index
    %c0_28 = arith.constant 0 : index
    %40 = vector.load %arg9[%c4, %c0_28] : memref<6x128xf32, #tpu.memory_space<vmem>>, vector<1x32xf32>
    %41 = vector.broadcast %40 : vector<1x32xf32> to vector<8x32xf32>
    %42 = arith.addf %39, %41 : vector<8x32xf32>
    %cst_29 = arith.constant 0.000000e+00 : f32
    %43 = vector.broadcast %cst_29 : f32 to vector<8x32xf32>
    %44 = arith.cmpf ogt, %42, %43 : vector<8x32xf32>
    %cst_30 = arith.constant 0.00999999977 : f32
    %45 = vector.broadcast %cst_30 : f32 to vector<8x32xf32>
    %46 = arith.mulf %45, %42 : vector<8x32xf32>
    %47 = arith.select %44, %42, %46 : vector<8x32xi1>, vector<8x32xf32>
    %c0_31 = arith.constant 0 : index
    %c0_32 = arith.constant 0 : index
    %48 = vector.load %arg8[%c0_31, %c0_32] : memref<32x128xf32, #tpu.memory_space<vmem>>, vector<32x128xf32>
    %cst_33 = arith.constant dense<0.000000e+00> : vector<8x128xf32>
    %49 = tpu.matmul %47, %48, %cst_33 {dimension_numbers = #tpu.dot_dimension_numbers<[1], [0], [0], [1], [0, 0, 1, 1], [], []>} : vector<8x32xf32>, vector<32x128xf32>, vector<8x128xf32> -> vector<8x128xf32>
    %c5 = arith.constant 5 : index
    %c0_34 = arith.constant 0 : index
    %50 = vector.load %arg9[%c5, %c0_34] : memref<6x128xf32, #tpu.memory_space<vmem>>, vector<1x128xf32>
    %51 = vector.broadcast %50 : vector<1x128xf32> to vector<8x128xf32>
    %52 = arith.addf %49, %51 : vector<8x128xf32>
    %c0_35 = arith.constant 0 : index
    %c0_36 = arith.constant 0 : index
    %53 = vector.load %arg10[%c0_35, %c0_36] : memref<8x128xf32, #tpu.memory_space<vmem>>, vector<8x128xf32>
    tpu.vector_store %arg10[%c0_35, %c0_36], %52 {strides = array<i32>} : memref<8x128xf32, #tpu.memory_space<vmem>>, vector<8x128xf32>,
    return
  }
  func.func @transform_0(%arg0: i32) -> (i32, i32) {
    %c0_i32 = arith.constant 0 : i32
    %c0_i32_0 = arith.constant 0 : i32
    return %arg0, %c0_i32 : i32, i32
  }
  func.func @transform_1(%arg0: i32) -> (i32, i32) {
    %c0_i32 = arith.constant 0 : i32
    %c0_i32_0 = arith.constant 0 : i32
    return %arg0, %c0_i32 : i32, i32
  }
  func.func @transform_2(%arg0: i32) -> (i32, i32) {
    %c0_i32 = arith.constant 0 : i32
    %c0_i32_0 = arith.constant 0 : i32
    %c0_i32_1 = arith.constant 0 : i32
    return %c0_i32, %c0_i32_0 : i32, i32
  }
  func.func @transform_3(%arg0: i32) -> (i32, i32) {
    %c0_i32 = arith.constant 0 : i32
    %c0_i32_0 = arith.constant 0 : i32
    %c0_i32_1 = arith.constant 0 : i32
    return %c0_i32, %c0_i32_0 : i32, i32
  }
  func.func @transform_4(%arg0: i32) -> (i32, i32) {
    %c0_i32 = arith.constant 0 : i32
    %c0_i32_0 = arith.constant 0 : i32
    %c0_i32_1 = arith.constant 0 : i32
    return %c0_i32, %c0_i32_0 : i32, i32
  }
  func.func @transform_5(%arg0: i32) -> (i32, i32) {
    %c0_i32 = arith.constant 0 : i32
    %c0_i32_0 = arith.constant 0 : i32
    %c0_i32_1 = arith.constant 0 : i32
    return %c0_i32, %c0_i32_0 : i32, i32
  }
  func.func @transform_6(%arg0: i32) -> (i32, i32) {
    %c0_i32 = arith.constant 0 : i32
    %c0_i32_0 = arith.constant 0 : i32
    %c0_i32_1 = arith.constant 0 : i32
    return %c0_i32, %c0_i32_0 : i32, i32
  }
  func.func @transform_7(%arg0: i32) -> (i32, i32) {
    %c0_i32 = arith.constant 0 : i32
    %c0_i32_0 = arith.constant 0 : i32
    %c0_i32_1 = arith.constant 0 : i32
    return %c0_i32, %c0_i32_0 : i32, i32
  }
  func.func @transform_8(%arg0: i32) -> (i32, i32) {
    %c0_i32 = arith.constant 0 : i32
    %c0_i32_0 = arith.constant 0 : i32
    %c0_i32_1 = arith.constant 0 : i32
    return %c0_i32, %c0_i32_0 : i32, i32
  }
  func.func @transform_9(%arg0: i32) -> (i32, i32) {
    %c0_i32 = arith.constant 0 : i32
    %c0_i32_0 = arith.constant 0 : i32
    return %arg0, %c0_i32 : i32, i32
  }
}

module attributes {stable_mosaic.version = 11 : i64} {
  func.func @_kernel_ext_noise(%arg0: i32, %arg1: memref<8x32xf32, #tpu.memory_space<vmem>>, %arg2: memref<8x16xf32, #tpu.memory_space<vmem>>, %arg3: memref<32x32xf32, #tpu.memory_space<vmem>>, %arg4: memref<32x32xf32, #tpu.memory_space<vmem>>, %arg5: memref<32x16xf32, #tpu.memory_space<vmem>>, %arg6: memref<16x32xf32, #tpu.memory_space<vmem>>, %arg7: memref<32x32xf32, #tpu.memory_space<vmem>>, %arg8: memref<32x128xf32, #tpu.memory_space<vmem>>, %arg9: memref<6x128xf32, #tpu.memory_space<vmem>>, %arg10: memref<8x128xf32, #tpu.memory_space<vmem>>) attributes {dimension_semantics = [#tpu.dimension_semantics<parallel>], iteration_bounds = array<i64: 2>, scalar_prefetch = 0 : i64, scratch_operands = 0 : i64, tpu.core_type = #tpu.core_type<tc>, window_params = [{transform_indices = @transform_0, window_bounds = array<i64: 8, 32>}, {transform_indices = @transform_1, window_bounds = array<i64: 8, 16>}, {pipeline_mode = #tpu.pipeline_mode<synchronous>, transform_indices = @transform_2, window_bounds = array<i64: 32, 32>}, {pipeline_mode = #tpu.pipeline_mode<synchronous>, transform_indices = @transform_3, window_bounds = array<i64: 32, 32>}, {pipeline_mode = #tpu.pipeline_mode<synchronous>, transform_indices = @transform_4, window_bounds = array<i64: 32, 16>}, {pipeline_mode = #tpu.pipeline_mode<synchronous>, transform_indices = @transform_5, window_bounds = array<i64: 16, 32>}, {pipeline_mode = #tpu.pipeline_mode<synchronous>, transform_indices = @transform_6, window_bounds = array<i64: 32, 32>}, {pipeline_mode = #tpu.pipeline_mode<synchronous>, transform_indices = @transform_7, window_bounds = array<i64: 32, 128>}, {pipeline_mode = #tpu.pipeline_mode<synchronous>, transform_indices = @transform_8, window_bounds = array<i64: 6, 128>}, {transform_indices = @transform_9, window_bounds = array<i64: 8, 128>}]} {
    %c0 = arith.constant 0 : index
    %c0_0 = arith.constant 0 : index
    %0 = vector.load %arg1[%c0, %c0_0] : memref<8x32xf32, #tpu.memory_space<vmem>>, vector<8x32xf32>
    %c0_1 = arith.constant 0 : index
    %c0_2 = arith.constant 0 : index
    %1 = vector.load %arg2[%c0_1, %c0_2] : memref<8x16xf32, #tpu.memory_space<vmem>>, vector<8x16xf32>
    %c0_3 = arith.constant 0 : index
    %c0_4 = arith.constant 0 : index
    %2 = vector.load %arg3[%c0_3, %c0_4] : memref<32x32xf32, #tpu.memory_space<vmem>>, vector<32x32xf32>
    %cst = arith.constant dense<0.000000e+00> : vector<8x32xf32>
    %3 = tpu.matmul %0, %2, %cst {dimension_numbers = #tpu.dot_dimension_numbers<[1], [0], [0], [1], [0, 0, 1, 1], [], []>} : vector<8x32xf32>, vector<32x32xf32>, vector<8x32xf32> -> vector<8x32xf32>
    %c0_5 = arith.constant 0 : index
    %c0_6 = arith.constant 0 : index
    %4 = vector.load %arg9[%c0_5, %c0_6] : memref<6x128xf32, #tpu.memory_space<vmem>>, vector<1x32xf32>
    %5 = vector.broadcast %4 : vector<1x32xf32> to vector<8x32xf32>
    %6 = arith.addf %3, %5 : vector<8x32xf32>
    %cst_7 = arith.constant 0.000000e+00 : f32
    %7 = vector.broadcast %cst_7 : f32 to vector<8x32xf32>
    %8 = arith.cmpf ogt, %6, %7 : vector<8x32xf32>
    %cst_8 = arith.constant 0.00999999977 : f32
    %9 = vector.broadcast %cst_8 : f32 to vector<8x32xf32>
    %10 = arith.mulf %9, %6 : vector<8x32xf32>
    %11 = arith.select %8, %6, %10 : vector<8x32xi1>, vector<8x32xf32>
    %c0_9 = arith.constant 0 : index
    %c0_10 = arith.constant 0 : index
    %12 = vector.load %arg4[%c0_9, %c0_10] : memref<32x32xf32, #tpu.memory_space<vmem>>, vector<32x32xf32>
    %cst_11 = arith.constant dense<0.000000e+00> : vector<8x32xf32>
    %13 = tpu.matmul %11, %12, %cst_11 {dimension_numbers = #tpu.dot_dimension_numbers<[1], [0], [0], [1], [0, 0, 1, 1], [], []>} : vector<8x32xf32>, vector<32x32xf32>, vector<8x32xf32> -> vector<8x32xf32>
    %c1 = arith.constant 1 : index
    %c0_12 = arith.constant 0 : index
    %14 = vector.load %arg9[%c1, %c0_12] : memref<6x128xf32, #tpu.memory_space<vmem>>, vector<1x32xf32>
    %15 = vector.broadcast %14 : vector<1x32xf32> to vector<8x32xf32>
    %16 = arith.addf %13, %15 : vector<8x32xf32>
    %cst_13 = arith.constant 0.000000e+00 : f32
    %17 = vector.broadcast %cst_13 : f32 to vector<8x32xf32>
    %18 = arith.cmpf ogt, %16, %17 : vector<8x32xf32>
    %cst_14 = arith.constant 0.00999999977 : f32
    %19 = vector.broadcast %cst_14 : f32 to vector<8x32xf32>
    %20 = arith.mulf %19, %16 : vector<8x32xf32>
    %21 = arith.select %18, %16, %20 : vector<8x32xi1>, vector<8x32xf32>
    %c0_15 = arith.constant 0 : index
    %c0_16 = arith.constant 0 : index
    %22 = vector.load %arg5[%c0_15, %c0_16] : memref<32x16xf32, #tpu.memory_space<vmem>>, vector<32x16xf32>
    %cst_17 = arith.constant dense<0.000000e+00> : vector<8x16xf32>
    %23 = tpu.matmul %21, %22, %cst_17 {dimension_numbers = #tpu.dot_dimension_numbers<[1], [0], [0], [1], [0, 0, 1, 1], [], []>} : vector<8x32xf32>, vector<32x16xf32>, vector<8x16xf32> -> vector<8x16xf32>
    %c2 = arith.constant 2 : index
    %c0_18 = arith.constant 0 : index
    %24 = vector.load %arg9[%c2, %c0_18] : memref<6x128xf32, #tpu.memory_space<vmem>>, vector<1x16xf32>
    %25 = vector.broadcast %24 : vector<1x16xf32> to vector<8x16xf32>
    %26 = arith.addf %23, %25 : vector<8x16xf32>
    %27 = arith.addf %26, %1 : vector<8x16xf32>
    %c0_19 = arith.constant 0 : index
    %c0_20 = arith.constant 0 : index
    %28 = vector.load %arg6[%c0_19, %c0_20] : memref<16x32xf32, #tpu.memory_space<vmem>>, vector<16x32xf32>
    %cst_21 = arith.constant dense<0.000000e+00> : vector<8x32xf32>
    %29 = tpu.matmul %27, %28, %cst_21 {dimension_numbers = #tpu.dot_dimension_numbers<[1], [0], [0], [1], [0, 0, 1, 1], [], []>} : vector<8x16xf32>, vector<16x32xf32>, vector<8x32xf32> -> vector<8x32xf32>
    %c3 = arith.constant 3 : index
    %c0_22 = arith.constant 0 : index
    %30 = vector.load %arg9[%c3, %c0_22] : memref<6x128xf32, #tpu.memory_space<vmem>>, vector<1x32xf32>
    %31 = vector.broadcast %30 : vector<1x32xf32> to vector<8x32xf32>
    %32 = arith.addf %29, %31 : vector<8x32xf32>
    %cst_23 = arith.constant 0.000000e+00 : f32
    %33 = vector.broadcast %cst_23 : f32 to vector<8x32xf32>
    %34 = arith.cmpf ogt, %32, %33 : vector<8x32xf32>
    %cst_24 = arith.constant 0.00999999977 : f32
    %35 = vector.broadcast %cst_24 : f32 to vector<8x32xf32>
    %36 = arith.mulf %35, %32 : vector<8x32xf32>
    %37 = arith.select %34, %32, %36 : vector<8x32xi1>, vector<8x32xf32>
    %c0_25 = arith.constant 0 : index
    %c0_26 = arith.constant 0 : index
    %38 = vector.load %arg7[%c0_25, %c0_26] : memref<32x32xf32, #tpu.memory_space<vmem>>, vector<32x32xf32>
    %cst_27 = arith.constant dense<0.000000e+00> : vector<8x32xf32>
    %39 = tpu.matmul %37, %38, %cst_27 {dimension_numbers = #tpu.dot_dimension_numbers<[1], [0], [0], [1], [0, 0, 1, 1], [], []>} : vector<8x32xf32>, vector<32x32xf32>, vector<8x32xf32> -> vector<8x32xf32>
    %c4 = arith.constant 4 : index
    %c0_28 = arith.constant 0 : index
    %40 = vector.load %arg9[%c4, %c0_28] : memref<6x128xf32, #tpu.memory_space<vmem>>, vector<1x32xf32>
    %41 = vector.broadcast %40 : vector<1x32xf32> to vector<8x32xf32>
    %42 = arith.addf %39, %41 : vector<8x32xf32>
    %cst_29 = arith.constant 0.000000e+00 : f32
    %43 = vector.broadcast %cst_29 : f32 to vector<8x32xf32>
    %44 = arith.cmpf ogt, %42, %43 : vector<8x32xf32>
    %cst_30 = arith.constant 0.00999999977 : f32
    %45 = vector.broadcast %cst_30 : f32 to vector<8x32xf32>
    %46 = arith.mulf %45, %42 : vector<8x32xf32>
    %47 = arith.select %44, %42, %46 : vector<8x32xi1>, vector<8x32xf32>
    %c0_31 = arith.constant 0 : index
    %c0_32 = arith.constant 0 : index
    %48 = vector.load %arg8[%c0_31, %c0_32] : memref<32x128xf32, #tpu.memory_space<vmem>>, vector<32x128xf32>
    %cst_33 = arith.constant dense<0.000000e+00> : vector<8x128xf32>
    %49 = tpu.matmul %47, %48, %cst_33 {dimension_numbers = #tpu.dot_dimension_numbers<[1], [0], [0], [1], [0, 0, 1, 1], [], []>} : vector<8x32xf32>, vector<32x128xf32>, vector<8x128xf32> -> vector<8x128xf32>
    %c5 = arith.constant 5 : index
    %c0_34 = arith.constant 0 : index
    %50 = vector.load %arg9[%c5, %c0_34] : memref<6x128xf32, #tpu.memory_space<vmem>>, vector<1x128xf32>
    %51 = vector.broadcast %50 : vector<1x128xf32> to vector<8x128xf32>
    %52 = arith.addf %49, %51 : vector<8x128xf32>
    %c0_35 = arith.constant 0 : index
    %c0_36 = arith.constant 0 : index
    %53 = vector.load %arg10[%c0_35, %c0_36] : memref<8x128xf32, #tpu.memory_space<vmem>>, vector<8x128xf32>
    tpu.vector_store %arg10[%c0_35, %c0_36], %52 {strides = array<i32>} : memref<8x128xf32, #tpu.memory_space<vmem>>, vector<8x128xf32>,
    return
  }
  func.func @transform_0(%arg0: i32) -> (i32, i32) {
    %c0_i32 = arith.constant 0 : i32
    %c0_i32_0 = arith.constant 0 : i32
    return %arg0, %c0_i32 : i32, i32
  }
  func.func @transform_1(%arg0: i32) -> (i32, i32) {
    %c0_i32 = arith.constant 0 : i32
    %c0_i32_0 = arith.constant 0 : i32
    return %arg0, %c0_i32 : i32, i32
  }
  func.func @transform_2(%arg0: i32) -> (i32, i32) {
    %c0_i32 = arith.constant 0 : i32
    %c0_i32_0 = arith.constant 0 : i32
    %c0_i32_1 = arith.constant 0 : i32
    return %c0_i32, %c0_i32_0 : i32, i32
  }
  func.func @transform_3(%arg0: i32) -> (i32, i32) {
    %c0_i32 = arith.constant 0 : i32
    %c0_i32_0 = arith.constant 0 : i32
    %c0_i32_1 = arith.constant 0 : i32
    return %c0_i32, %c0_i32_0 : i32, i32
  }
  func.func @transform_4(%arg0: i32) -> (i32, i32) {
    %c0_i32 = arith.constant 0 : i32
    %c0_i32_0 = arith.constant 0 : i32
    %c0_i32_1 = arith.constant 0 : i32
    return %c0_i32, %c0_i32_0 : i32, i32
  }
  func.func @transform_5(%arg0: i32) -> (i32, i32) {
    %c0_i32 = arith.constant 0 : i32
    %c0_i32_0 = arith.constant 0 : i32
    %c0_i32_1 = arith.constant 0 : i32
    return %c0_i32, %c0_i32_0 : i32, i32
  }
  func.func @transform_6(%arg0: i32) -> (i32, i32) {
    %c0_i32 = arith.constant 0 : i32
    %c0_i32_0 = arith.constant 0 : i32
    %c0_i32_1 = arith.constant 0 : i32
    return %c0_i32, %c0_i32_0 : i32, i32
  }
  func.func @transform_7(%arg0: i32) -> (i32, i32) {
    %c0_i32 = arith.constant 0 : i32
    %c0_i32_0 = arith.constant 0 : i32
    %c0_i32_1 = arith.constant 0 : i32
    return %c0_i32, %c0_i32_0 : i32, i32
  }
  func.func @transform_8(%arg0: i32) -> (i32, i32) {
    %c0_i32 = arith.constant 0 : i32
    %c0_i32_0 = arith.constant 0 : i32
    %c0_i32_1 = arith.constant 0 : i32
    return %c0_i32, %c0_i32_0 : i32, i32
  }
  func.func @transform_9(%arg0: i32) -> (i32, i32) {
    %c0_i32 = arith.constant 0 : i32
    %c0_i32_0 = arith.constant 0 : i32
    return %arg0, %c0_i32 : i32, i32
  }
}

</mosaic_0001>

<bundles_post_ra>
// kernel: tpu_custom_call.1
= control target key start
LH: loop header
LB: loop body
LE: loop exit
PB: predicated region body
PF: predicated region fallthrough
CT: control target
= control target key end

     0   :  { %s1446_s0 = inlined_call_operand.vmem [shape: f32[16,32], index: 0, kind: input, shape index: {}]   ;;  %s1447_s1 = inlined_call_operand.hbm [shape: f32[16,16], index: 1, kind: input, shape index: {}]   ;;  %s1448_s2 = inlined_call_operand.vmem [shape: f32[32,32], index: 2, kind: input, shape index: {}]   ;;  %s1449_s3 = inlined_call_operand.hbm [shape: f32[32,32], index: 3, kind: input, shape index: {}]   ;;  %s1450_s4 = inlined_call_operand.vmem [shape: f32[32,16], index: 4, kind: input, shape index: {}]   ;;  %s1451_s5 = inlined_call_operand.hbm [shape: f32[16,32], index: 5, kind: input, shape index: {}]   ;;  %s1452_s6 = inlined_call_operand.hbm [shape: f32[32,32], index: 6, kind: input, shape index: {}]   ;;  %s1453_s7 = inlined_call_operand.hbm [shape: f32[32,128], index: 7, kind: input, shape index: {}]   ;;  %s1454_s8 = inlined_call_operand.hbm [shape: f32[6,128], index: 8, kind: input, shape index: {}]   ;;  %s1455_s9 = inlined_call_operand.hbm [shape: f32[16,128], index: 9, kind: output, shape index: {}]  }
   0x1   :  { %1456 = sst [smem:[#allocation19_spill]] %s1449_s3 }
   0x2   :  { %1457 = sst [smem:[#allocation20_spill]] %s1451_s5 }
   0x3   :  { %1458 = sst [smem:[#allocation21_spill]] %s1452_s6 }
   0x4   :  { %14 = vsyncpa [#allocation3], 0 }
   0x5   :  { %16 = vsyncpa [#allocation3 + $0x1], 0 }
   0x6   :  { %17 = vsyncpa [#allocation6], 0 }
   0x7   :  { %18 = vsyncpa [#allocation9], 0 }
   0x8   :  { %19 = vsyncpa [#allocation12], 0 }
   0x9   :  { %20 = vsyncpa [#allocation4], 0 }
   0xa   :  { %22 = vsyncpa [#allocation4 + $0x1], 0  ;;  %s1235_s30 = smov 0   ;;  %s1237_s10 = smov 0  }
   0xb   :  { %s1239_s11 = smov 0   ;;  %s1241_s12 = smov 0  }
   0xc LB: > { %s1459_s3 = sld [smem:[#allocation19_spill]]  ;;  %s1259_s16 = sadd.s32 4294967295, %s1176_s12   ;;  %s1176_s12 = sphi %s1241_s12, %s1472_s12   ;;  %s1172_s11 = sphi %s1239_s11, %s1471_s11   ;;  %s1168_s10 = sphi %s1237_s10, %s1470_s10   ;;  %s1164_s30 = sphi %s1235_s30, %s1469_s30  }
   0xd   : > { %p785_p0 = scmp.ge.s32.totalorder %s1176_s12, 1  ;;  %p75_p1 = scmp.eq.s32.totalorder %s1259_s16, 0 }
   0xe   : > { %p258_p2 = scmp.lt.s32.totalorder %s1176_s12, 3  ;;  %s1178_s18 = smov [#allocation5]  }
   0xf   : > { %s274_s19 = sshll.u32 %s1178_s18, 4  ;;  %s1461_s6 = sld [smem:[#allocation21_spill]]  ;;  %s275_s19 = int_to_ptr.vmem [resolvable:$true] %s274_s19 }
  0x10   : > { %p1264_p3 = pnand %p785_p0, %p258_p2  ;;  %s1463_s5 = sld [smem:[#allocation20_spill]] }
  0x11   : > { %s1179_s27 = smov [#allocation8]   ;;  %s1180_s29 = smov 128  }
  0x12   : > { %s272_s15 = sshll.u32 %s1459_s3, 4  ;;  %p837_p4 = pneg %p1264_p3  ;;  %s273_s15 = int_to_ptr.hbm [resolvable:$true] %s272_s15 }
  0x13   : > { %s305_s28 = sshll.u32 %s1179_s27, 4  ;;  %s1181_s13 = smov 8   ;;  %s306_s28 = int_to_ptr.vmem [resolvable:$true] %s305_s28 }
  0x14   : > { %p1276_p6 = pnand %p837_p4, %p75_p1  ;;  %s317_s20 = sshll.u32 %s1453_s7, 4  ;;  %s318_s20 = int_to_ptr.hbm [resolvable:$true] %s317_s20 }
  0x15   : > { %s303_s22 = sshll.u32 %s1461_s6, 4  ;;  %s1182_s21 = smov [#allocation7]   ;;  %s304_s22 = int_to_ptr.hbm [resolvable:$true] %s303_s22 }
  0x16   : > { %s289_s26 = sshll.u32 %s1463_s5, 4  ;;  %s291_s24 = sshll.u32 %s1182_s21, 4  ;;  %s290_s26 = int_to_ptr.hbm [resolvable:$true] %s289_s26  ;;  %s292_s24 = int_to_ptr.vmem [resolvable:$true] %s291_s24 }
  0x17   : > { %840 = dma.hbm_to_vmem [thread:$0]  (!%p1276_p6), %s273_s15, 512, %s275_s19, [#allocation6], %s1180_s29, %s1180_s29, %s1181_s13  }
  0x18   : > { %846 = dma.hbm_to_vmem [thread:$0]  (!%p1276_p6), %s304_s22, 512, %s306_s28, [#allocation9], %s1180_s29, %s1180_s29, %s1181_s13  }
  0x19   : > { %843 = dma.hbm_to_vmem [thread:$0]  (!%p1276_p6), %s290_s26, 256, %s292_s24, [#allocation6], %s1180_s29, %s1180_s29, %s1181_s13  }
  0x1a   : > { %s1183_s15 = smov [#allocation10]   ;;  %s332_s27 = sshll.u32 %s1454_s8, 4  ;;  %s333_s27 = int_to_ptr.hbm [resolvable:$true] %s332_s27 }
  0x1b   : > { %s319_s19 = sshll.u32 %s1183_s15, 4  ;;  %s1184_s28 = smov [#allocation11]   ;;  %s320_s19 = int_to_ptr.vmem [resolvable:$true] %s319_s19 }
  0x1c   : > { %849 = dma.hbm_to_vmem [thread:$0]  (!%p1276_p6), %s318_s20, 512, %s320_s19, [#allocation9], %s1180_s29, %s1180_s29, %s1181_s13  }
  0x1d   : > { %s334_s14 = sshll.u32 %s1184_s28, 4  ;;  %s784_s26 = sadd.s32 4294967294, %s1176_s12   ;;  %s335_s14 = int_to_ptr.vmem [resolvable:$true] %s334_s14 }
  0x1e   : > { %852 = dma.hbm_to_vmem [thread:$0]  (!%p1276_p6), %s333_s27, 128, %s335_s14, [#allocation12]  }
  0x1f   : > { %s1301_s18 = sadd.s32 1, %s1176_s12   ;;  %s61_s21 = sadd.s32 1, %s1172_s11 }
  0x20   : > { %s58_s24 = ssub.s32 %s1176_s12, %s1301_s18  ;;  %p68_p7 = scmp.ne.s32.totalorder %s1172_s11, %s1168_s10 }
  0x21   : > { %p59_p8 = scmp.eq.s32.totalorder %s58_s24, 0  ;;  %p69_p9 = scmp.eq.s32.totalorder %s1176_s12, 0 }
  0x22   : > { %p74_p10 = scmp.ne.s32.totalorder %s1168_s10, %s1164_s30  ;;  %p245_p11 = scmp.eq.s32.totalorder %s1259_s16, 1 }
  0x23   : > { %s1313_s29 = scalar_select %p59_p8, %s1172_s11, %s61_s21  }
  0x24   : > { %p1317_p12 = por %p75_p1, %p74_p10  ;;  %p1321_p13 = por %p245_p11, %p68_p7 }
  0x25   : > { %p251_p0 = scmp.eq.s32.totalorder %s784_s26, 1  ;;  %p70_p2 = por %p69_p9, %p68_p7 }
  0x26   : > { %s352_s20 = sand.u32 1, %s1172_s11   ;;  %p866_p6 = scmp.lt.s32.totalorder %s1176_s12, 2 }
  0x27   : > { %p1326_p4 = por %p251_p0, %p74_p10  ;;  %s792_s19 = sshll.u32 %s352_s20, 3 }
  0x28   : > { %s793_s22 = sshll.u32 %s1176_s12, 3  ;;  %s356_s21 = scalar_lea.vmem [#allocation2], %s792_s19 }
  0x29   : > { %s360_s28 = scalar_lea.hbm %s1447_s1, %s793_s22  ;;  %s364_s24 = sshll.u32 %s356_s21, 4  ;;  %s365_s24 = int_to_ptr.vmem [resolvable:$true] %s364_s24 }
  0x2a   : > { %s362_s14 = sshll.u32 %s360_s28, 4  ;;  %p1335_p8 = pnand %p866_p6, %p70_p2  ;;  %s363_s14 = int_to_ptr.hbm [resolvable:$true] %s362_s14 }
  0x2b   : > { %s353_s3 = scalar_lea.sflag [#allocation3], %s352_s20  ;;  %s1068_s5 = sshra.s32 %s363_s14, 4  ;;  %s1069_s5 = int_to_ptr.hbm [resolvable:$true] %s1068_s5 }
  0x2c   : > { %s1070_s6 = scalar_lea.hbm %s1069_s5, 8  ;;  %p1072_p9 = pneg %p1335_p8 }
  0x2d   : > { %p1071_p7 = scmp.ne.s32.totalorder %s1069_s5, %s1070_s6  ;;  %s1075_s19 = scalar_lea.hbm %s1447_s1, 16 }
  0x2e   : > { %p1076_p0 = scmp.lt.s32.totalorder %s1069_s5, %s1447_s1  ;;  %p1077_p2 = scmp.lt.s32.totalorder %s1075_s19, %s1070_s6 }
  0x2f   : > { %p1073_p10 = pnand %p1072_p9, %p1071_p7 }
  0x30   : > { %p1078_p6 = por %p1077_p2, %p1076_p0 }
  0x31   : > { %p1074_p11 = pneg %p1073_p10 }
  0x33   : > { %p1079_p5 = pnand %p1078_p6, %p1074_p11 }
  0x35   : > { %1082 = shalt.err (!%p1079_p5)
}
  0x36   : > { %856 = dma.hbm_to_vmem [thread:$0]  (!%p1335_p8), %s363_s14, 128, %s365_s24, %s353_s3  }
  0x37   : > { %373 = sbr.rel (%p1264_p3) target bundleno = 878 (0x36e), region = 56  ;;  %s1352_s20 = sand.u32 (!%p1264_p3), 1, %s1168_s10  }
  0x38   : > { %s795_s21 = sshll.u32 (!%p1264_p3), %s1352_s20, 3  ;;  %s376_s22 = scalar_lea.sflag (!%p1264_p3), [#allocation3], %s1352_s20 }
  0x39   : > { %s1358_s5 = scalar_lea.vmem (!%p1264_p3), [#allocation2], %s795_s21 }
  0x3c   : > { %1143 = dma.done.wait (%p1317_p12), %s376_s22, 128  }
  0x3d   : > { %1145 = vsyncadd (%p1317_p12), %s376_s22, 4294967168 }
  0x3e   : > { %1147 = dma.done.wait (%p75_p1), [#allocation6], 768  }
  0x3f   : > { %1149 = vsyncadd (%p75_p1), [#allocation6], 4294966528 }
  0x40   : > { %1151 = dma.done.wait (%p75_p1), [#allocation9], 1024  }
  0x41   : > { %1153 = vsyncadd (%p75_p1), [#allocation9], 4294966272 }
  0x42   : > { %1155 = dma.done.wait (%p75_p1), [#allocation12], 128  }
  0x43   : > { %1157 = vsyncadd (%p75_p1), [#allocation12], 4294967168  ;;  %p444_p3 = scmp.lt.s32.totalorder %s1259_s16, 1  ;;  %v453_v0 = vld [vmem:[%s1448_s2 + $0x18] sm:$0xff]  ;;  %v452_v1 = vld [vmem:[%s1448_s2 + $0x10] sm:$0xff]  ;;  %vm456_vm0 = vcmask 261120  }
  0x44   : > { %472 = vmatpush.msra.mxu0 %v453_v0  ;;  %v486_v2 = vld [vmem:[#allocation5 + $0x18] sm:$0xff]  ;;  %v450_v4 = vld [vmem:[%s1448_s2] sm:$0xff]  ;;  %v484_v7 = vld [vmem:[#allocation5 + $0x8] sm:$0xff]  ;;  %vm549_vm3 = vcmask 130048   ;;  %s639_s23 = scalar_lea.sflag [#allocation4], %s1352_s20  ;;  %s1118_s25 = scalar_lea.hbm %s1455_s9, 16 }
  0x45   : > { %s445_s3 = scalar_select %p444_p3, %s1259_s16, 1  ;;  %v451_v3 = vld [vmem:[%s1448_s2 + $0x8] sm:$0xff]  ;;  %504 = vmatpush.msra.mxu1 %v486_v2  ;;  %v485_v6 = vld [vmem:[#allocation5 + $0x10] sm:$0xff]  ;;  %v483_v8 = vld [vmem:[#allocation5] sm:$0xff] }
  0x46   : > { %473 = vmatpush.msra.mxu0 %v452_v1  ;;  %v518_v9 = vld [vmem:[%s1450_s4 + $0x18] sm:$0xff]  ;;  %v912_v10 = vld [vmem:[#allocation11] ss:$0 sm:$0xff]  ;;  %v517_v15 = vld [vmem:[%s1450_s4 + $0x10] sm:$0xff] }
  0x47   : > { %s802_s6 = sshll.u32 %s445_s3, 3  ;;  %505 = vmatpush.msra.mxu1 %v485_v6  ;;  %536 = vmatpush.msra.mxu2 %v518_v9  ;;  %v516_v16 = vld [vmem:[%s1450_s4 + $0x8] sm:$0xff]  ;;  %v515_v17 = vld [vmem:[%s1450_s4] sm:$0xff]  ;;  %v546_v23 = vld [vmem:[#allocation7 + $0x8] sm:$0xff]  ;;  %s443_s3 = scalar_lea.vmem [#allocation13], %s795_s21 }
  0x48   : > { %s447_s28 = scalar_lea.vmem %s1446_s0, %s802_s6  ;;  %474 = vmatpush.msra.mxu0 %v451_v3  ;;  %v913_v18 = vld [vmem:[#allocation11 + $0x1] ss:$0 sm:$0xff]  ;;  %567 = vmatpush.msra.mxu3 %v546_v23  ;;  %v545_v24 = vld [vmem:[#allocation7] sm:$0xff]  ;;  %v579_v25 = vld [vmem:[#allocation8 + $0x18] sm:$0xff]  ;;  %s651_s17 = sshll.u32 %s443_s3, 4  ;;  %s652_s17 = int_to_ptr.vmem [resolvable:$true] %s651_s17 }
  0x49   : > { %v448_v5 = vld [vmem:[%s447_s28] sm:$0xff]  ;;  %506 = vmatpush.msra.mxu1 %v484_v7  ;;  %537 = vmatpush.msra.mxu2 %v517_v15  ;;  %v578_v31 = vld [vmem:[#allocation8 + $0x10] sm:$0xff]  ;;  %v577_v32 = vld [vmem:[#allocation8 + $0x8] sm:$0xff] }
  0x4a   : > { %475 = vmatpush.msra.mxu0 %v450_v4  ;;  %568 = vmatpush.msra.mxu3 %v545_v24  ;;  %v914_v26 = vld [vmem:[#allocation11 + $0x2] ss:$0 sm:$0xff]  ;;  %v611_v34 = vld [vmem:[#allocation10 + $0x18] sm:$0xff]  ;;  %v915_v35 = vld [vmem:[#allocation11 + $0x3] ss:$0 sm:$0xff] }
  0x4b   : > { %803 = vmatmul.msk.f32.vlgmr.msra.gmra.mxu0 %vm456_vm0, %v448_v5  ;;  %507 = vmatpush.msra.mxu1 %v483_v8  ;;  %v449_v27 = vld [vmem:[%s1358_s5] sm:$0xff]  ;;  %v610_v40 = vld [vmem:[#allocation10 + $0x10] sm:$0xff]  ;;  %s810_s5 = sshll.u32 %s1259_s16, 3 }
  0x4c   : > { %538 = vmatpush.msra.mxu2 %v516_v16  ;;  %597 = vmatpush.msrb.mxu3 %v579_v25  ;;  %v576_v33 = vld [vmem:[#allocation8] sm:$0xff]  ;;  %v609_v41 = vld [vmem:[#allocation10 + $0x8] sm:$0xff]  ;;  %s649_s22 = scalar_lea.hbm %s1455_s9, %s810_s5 }
  0x4d   : > { %629 = vmatpush.msrb.mxu0 %v611_v34  ;;  %v608_v42 = vld [vmem:[#allocation10] sm:$0xff]  ;;  %s653_s6 = sshll.u32 %s649_s22, 4  ;;  %s654_s6 = int_to_ptr.hbm [resolvable:$true] %s653_s6 }
  0x4e   : > { %539 = vmatpush.msra.mxu2 %v515_v17  ;;  %598 = vmatpush.msrb.mxu3 %v578_v31  ;;  %v916_v43 = vld [vmem:[#allocation11 + $0x4] ss:$0 sm:$0xff]  ;;  %v917_v48 = vld [vmem:[#allocation11 + $0x5] ss:$0 sm:$0xff]  ;;  %s1112_s14 = sshra.s32 %s654_s6, 4  ;;  %s1113_s14 = int_to_ptr.hbm [resolvable:$true] %s1112_s14 }
  0x4f   : > { %630 = vmatpush.msrb.mxu0 %v610_v40  ;;  %s1114_s24 = scalar_lea.hbm %s1113_s14, 8  ;;  %p1119_p8 = scmp.lt.s32.totalorder %s1113_s14, %s1455_s9 }
  0x50   : > { %599 = vmatpush.msrb.mxu3 %v577_v32  ;;  %p1115_p1 = scmp.ne.s32.totalorder %s1113_s14, %s1114_s24  ;;  %p1120_p7 = scmp.lt.s32.totalorder %s1118_s25, %s1114_s24 }
  0x51   : > { %631 = vmatpush.msrb.mxu0 %v609_v41 }
  0x52   : > { %600 = vmatpush.msrb.mxu3 %v576_v33  ;;  %p1116_p5 = pnand %p1115_p1, %p1321_p13  ;;  %p1121_p9 = por %p1120_p7, %p1119_p8 }
  0x53   : > { %632 = vmatpush.msrb.mxu0 %v608_v42 }
  0x54   : > { %p1117_p12 = pneg %p1116_p5 }
  0x56   : > { %p1122_p10 = pnand %p1121_p9, %p1117_p12 }
  0xc8   : > { %v477_v11 = vpop.f32.mrf.mxu0 }
  0xc9   : > { %v478_v12 = vadd.f32 %v912_v10, %v477_v11 }
  0xcb   : > { %v481_v13 = vmul.f32 0.01, %v478_v12  ;;  %vm480_vm1 = vcmp.gt.f32.partialorder %v478_v12, 0.0 }
  0xcd   : > { %v482_v14 = vsel %vm480_vm1, %v478_v12, %v481_v13 }
  0xce   : > { %804 = vmatmul.msk.f32.vlgmr.msra.gmra.mxu1 %vm456_vm0, %v482_v14 }
 0x14b   : > { %v509_v19 = vpop.f32.mrf.mxu1 }
 0x14c   : > { %v510_v20 = vadd.f32 %v913_v18, %v509_v19 }
 0x14e   : > { %v513_v21 = vmul.f32 0.01, %v510_v20  ;;  %vm512_vm2 = vcmp.gt.f32.partialorder %v510_v20, 0.0 }
 0x150   : > { %v514_v22 = vsel %vm512_vm2, %v510_v20, %v513_v21 }
 0x151   : > { %805 = vmatmul.msk.f32.vlgmr.msra.gmra.mxu2 %vm456_vm0, %v514_v22 }
 0x1d4   : > { %v541_v28 = vpop.f32.mrf.mxu2 }
 0x1d5   : > { %v542_v29 = vadd.f32 %v914_v26, %v541_v28 }
 0x1d7   : > { %v544_v30 = vadd.f32 %v542_v29, %v449_v27 }
 0x1d9   : > { %806 = vmatmul.msk.f32.vlgmr.msra.gmra.mxu3 %vm549_vm3, %v544_v30 }
 0x25c   : > { %v570_v36 = vpop.f32.mrf.mxu3 }
 0x25d   : > { %v571_v37 = vadd.f32 %v915_v35, %v570_v36 }
 0x25f   : > { %vm573_vm4 = vcmp.gt.f32.partialorder %v571_v37, 0.0  ;;  %v574_v38 = vmul.f32 0.01, %v571_v37 }
 0x261   : > { %v575_v39 = vsel %vm573_vm4, %v571_v37, %v574_v38 }
 0x262   : > { %807 = vmatmul.msk.f32.vlgmr.msrb.gmra.mxu3 %vm456_vm0, %v575_v39 }
 0x2e5   : > { %v602_v44 = vpop.f32.mrf.mxu3 }
 0x2e6   : > { %v603_v45 = vadd.f32 %v916_v43, %v602_v44 }
 0x2e8   : > { %vm605_vm5 = vcmp.gt.f32.partialorder %v603_v45, 0.0  ;;  %v606_v46 = vmul.f32 0.01, %v603_v45 }
 0x2ea   : > { %v607_v47 = vsel %vm605_vm5, %v603_v45, %v606_v46 }
 0x2eb   : > { %808 = vmatmul.msk.f32.vlgmr.msrb.gmra.mxu0 %vm456_vm0, %v607_v47 }
 0x368   : > { %v634_v49 = vpop.f32.mrf.mxu0 }
 0x369   : > { %v635_v50 = vadd.f32 %v917_v48, %v634_v49 }
 0x36b   : > { %637 = vst [vmem:[%s443_s3] sm:$0xff] %v635_v50 }
 0x36c   : > { %1125 = shalt.err (!%p1122_p10)
}
 0x36d   : > { %835 = dma.vmem_to_hbm [thread:$0]  (%p1321_p13), %s652_s17, 128, %s654_s6, %s639_s23  }
 0x36e PF: > { %s665_s20 = sand.u32 1, %s1164_s30   ;;  %p1468_p11 = scmp.ge.s32.totalorder %s1176_s12, 2 }
 0x36f   : > { %s666_s5 = scalar_lea.sflag [#allocation4], %s665_s20 }
 0x370   : > { %p858_p0 = pnand %p1468_p11, %p1326_p4 }
 0x372   : > { %p859_p2 = pneg %p858_p0 }
 0x374   : > { %1159 = dma.done.wait (%p859_p2), %s666_s5, 128  }
 0x375   : > { %1161 = vsyncadd (%p859_p2), %s666_s5, 4294967168  ;;  %p25_p6 = scmp.ge.s32.totalorder %s1301_s18, 4   ;;  %s1469_s30 = smov %s1168_s10 }
 0x376   : > { %s1470_s10 = smov %s1172_s11  ;;  %s1471_s11 = smov %s1313_s29 }
 0x377   : > { %s1472_s12 = smov %s1301_s18  ;;  %27 = sbr.rel (!%p25_p6) target bundleno = 12 (0xc), region = 124 }
 0x37c   :  { %672 = vsyncpa [#allocation3], 1 }
 0x37d   :  { %674 = vsyncpa [#allocation3 + $0x1], 1 }
 0x37e   :  { %675 = vsyncpa [#allocation6], 1 }
 0x37f   :  { %676 = vsyncpa [#allocation9], 1 }
 0x380   :  { %677 = vsyncpa [#allocation12], 1 }
 0x381   :  { %678 = vsyncpa [#allocation4], 1 }
 0x382   :  { %680 = vsyncpa [#allocation4 + $0x1], 1 }

// kernel: tpu_custom_call.1
= control target key start
LH: loop header
LB: loop body
LE: loop exit
PB: predicated region body
PF: predicated region fallthrough
CT: control target
= control target key end

     0   :  { %s1446_s0 = inlined_call_operand.vmem [shape: f32[16,32], index: 0, kind: input, shape index: {}]   ;;  %s1447_s1 = inlined_call_operand.hbm [shape: f32[16,16], index: 1, kind: input, shape index: {}]   ;;  %s1448_s2 = inlined_call_operand.vmem [shape: f32[32,32], index: 2, kind: input, shape index: {}]   ;;  %s1449_s3 = inlined_call_operand.hbm [shape: f32[32,32], index: 3, kind: input, shape index: {}]   ;;  %s1450_s4 = inlined_call_operand.vmem [shape: f32[32,16], index: 4, kind: input, shape index: {}]   ;;  %s1451_s5 = inlined_call_operand.hbm [shape: f32[16,32], index: 5, kind: input, shape index: {}]   ;;  %s1452_s6 = inlined_call_operand.hbm [shape: f32[32,32], index: 6, kind: input, shape index: {}]   ;;  %s1453_s7 = inlined_call_operand.hbm [shape: f32[32,128], index: 7, kind: input, shape index: {}]   ;;  %s1454_s8 = inlined_call_operand.hbm [shape: f32[6,128], index: 8, kind: input, shape index: {}]   ;;  %s1455_s9 = inlined_call_operand.hbm [shape: f32[16,128], index: 9, kind: output, shape index: {}]  }
   0x1   :  { %1456 = sst [smem:[#allocation19_spill]] %s1449_s3 }
   0x2   :  { %1457 = sst [smem:[#allocation20_spill]] %s1451_s5 }
   0x3   :  { %1458 = sst [smem:[#allocation21_spill]] %s1452_s6 }
   0x4   :  { %14 = vsyncpa [#allocation3], 0 }
   0x5   :  { %16 = vsyncpa [#allocation3 + $0x1], 0 }
   0x6   :  { %17 = vsyncpa [#allocation6], 0 }
   0x7   :  { %18 = vsyncpa [#allocation9], 0 }
   0x8   :  { %19 = vsyncpa [#allocation12], 0 }
   0x9   :  { %20 = vsyncpa [#allocation4], 0 }
   0xa   :  { %22 = vsyncpa [#allocation4 + $0x1], 0  ;;  %s1235_s30 = smov 0   ;;  %s1237_s10 = smov 0  }
   0xb   :  { %s1239_s11 = smov 0   ;;  %s1241_s12 = smov 0  }
   0xc LB: > { %s1459_s3 = sld [smem:[#allocation19_spill]]  ;;  %s1259_s16 = sadd.s32 4294967295, %s1176_s12   ;;  %s1176_s12 = sphi %s1241_s12, %s1472_s12   ;;  %s1172_s11 = sphi %s1239_s11, %s1471_s11   ;;  %s1168_s10 = sphi %s1237_s10, %s1470_s10   ;;  %s1164_s30 = sphi %s1235_s30, %s1469_s30  }
   0xd   : > { %p785_p0 = scmp.ge.s32.totalorder %s1176_s12, 1  ;;  %p75_p1 = scmp.eq.s32.totalorder %s1259_s16, 0 }
   0xe   : > { %p258_p2 = scmp.lt.s32.totalorder %s1176_s12, 3  ;;  %s1178_s18 = smov [#allocation5]  }
   0xf   : > { %s274_s19 = sshll.u32 %s1178_s18, 4  ;;  %s1461_s6 = sld [smem:[#allocation21_spill]]  ;;  %s275_s19 = int_to_ptr.vmem [resolvable:$true] %s274_s19 }
  0x10   : > { %p1264_p3 = pnand %p785_p0, %p258_p2  ;;  %s1463_s5 = sld [smem:[#allocation20_spill]] }
  0x11   : > { %s1179_s27 = smov [#allocation8]   ;;  %s1180_s29 = smov 128  }
  0x12   : > { %s272_s15 = sshll.u32 %s1459_s3, 4  ;;  %p837_p4 = pneg %p1264_p3  ;;  %s273_s15 = int_to_ptr.hbm [resolvable:$true] %s272_s15 }
  0x13   : > { %s305_s28 = sshll.u32 %s1179_s27, 4  ;;  %s1181_s13 = smov 8   ;;  %s306_s28 = int_to_ptr.vmem [resolvable:$true] %s305_s28 }
  0x14   : > { %p1276_p6 = pnand %p837_p4, %p75_p1  ;;  %s317_s20 = sshll.u32 %s1453_s7, 4  ;;  %s318_s20 = int_to_ptr.hbm [resolvable:$true] %s317_s20 }
  0x15   : > { %s303_s22 = sshll.u32 %s1461_s6, 4  ;;  %s1182_s21 = smov [#allocation7]   ;;  %s304_s22 = int_to_ptr.hbm [resolvable:$true] %s303_s22 }
  0x16   : > { %s289_s26 = sshll.u32 %s1463_s5, 4  ;;  %s291_s24 = sshll.u32 %s1182_s21, 4  ;;  %s290_s26 = int_to_ptr.hbm [resolvable:$true] %s289_s26  ;;  %s292_s24 = int_to_ptr.vmem [resolvable:$true] %s291_s24 }
  0x17   : > { %840 = dma.hbm_to_vmem [thread:$0]  (!%p1276_p6), %s273_s15, 512, %s275_s19, [#allocation6], %s1180_s29, %s1180_s29, %s1181_s13  }
  0x18   : > { %846 = dma.hbm_to_vmem [thread:$0]  (!%p1276_p6), %s304_s22, 512, %s306_s28, [#allocation9], %s1180_s29, %s1180_s29, %s1181_s13  }
  0x19   : > { %843 = dma.hbm_to_vmem [thread:$0]  (!%p1276_p6), %s290_s26, 256, %s292_s24, [#allocation6], %s1180_s29, %s1180_s29, %s1181_s13  }
  0x1a   : > { %s1183_s15 = smov [#allocation10]   ;;  %s332_s27 = sshll.u32 %s1454_s8, 4  ;;  %s333_s27 = int_to_ptr.hbm [resolvable:$true] %s332_s27 }
  0x1b   : > { %s319_s19 = sshll.u32 %s1183_s15, 4  ;;  %s1184_s28 = smov [#allocation11]   ;;  %s320_s19 = int_to_ptr.vmem [resolvable:$true] %s319_s19 }
  0x1c   : > { %849 = dma.hbm_to_vmem [thread:$0]  (!%p1276_p6), %s318_s20, 512, %s320_s19, [#allocation9], %s1180_s29, %s1180_s29, %s1181_s13  }
  0x1d   : > { %s334_s14 = sshll.u32 %s1184_s28, 4  ;;  %s784_s26 = sadd.s32 4294967294, %s1176_s12   ;;  %s335_s14 = int_to_ptr.vmem [resolvable:$true] %s334_s14 }
  0x1e   : > { %852 = dma.hbm_to_vmem [thread:$0]  (!%p1276_p6), %s333_s27, 128, %s335_s14, [#allocation12]  }
  0x1f   : > { %s1301_s18 = sadd.s32 1, %s1176_s12   ;;  %s61_s21 = sadd.s32 1, %s1172_s11 }
  0x20   : > { %s58_s24 = ssub.s32 %s1176_s12, %s1301_s18  ;;  %p68_p7 = scmp.ne.s32.totalorder %s1172_s11, %s1168_s10 }
  0x21   : > { %p59_p8 = scmp.eq.s32.totalorder %s58_s24, 0  ;;  %p69_p9 = scmp.eq.s32.totalorder %s1176_s12, 0 }
  0x22   : > { %p74_p10 = scmp.ne.s32.totalorder %s1168_s10, %s1164_s30  ;;  %p245_p11 = scmp.eq.s32.totalorder %s1259_s16, 1 }
  0x23   : > { %s1313_s29 = scalar_select %p59_p8, %s1172_s11, %s61_s21  }
  0x24   : > { %p1317_p12 = por %p75_p1, %p74_p10  ;;  %p1321_p13 = por %p245_p11, %p68_p7 }
  0x25   : > { %p251_p0 = scmp.eq.s32.totalorder %s784_s26, 1  ;;  %p70_p2 = por %p69_p9, %p68_p7 }
  0x26   : > { %s352_s20 = sand.u32 1, %s1172_s11   ;;  %p866_p6 = scmp.lt.s32.totalorder %s1176_s12, 2 }
  0x27   : > { %p1326_p4 = por %p251_p0, %p74_p10  ;;  %s792_s19 = sshll.u32 %s352_s20, 3 }
  0x28   : > { %s793_s22 = sshll.u32 %s1176_s12, 3  ;;  %s356_s21 = scalar_lea.vmem [#allocation2], %s792_s19 }
  0x29   : > { %s360_s28 = scalar_lea.hbm %s1447_s1, %s793_s22  ;;  %s364_s24 = sshll.u32 %s356_s21, 4  ;;  %s365_s24 = int_to_ptr.vmem [resolvable:$true] %s364_s24 }
  0x2a   : > { %s362_s14 = sshll.u32 %s360_s28, 4  ;;  %p1335_p8 = pnand %p866_p6, %p70_p2  ;;  %s363_s14 = int_to_ptr.hbm [resolvable:$true] %s362_s14 }
  0x2b   : > { %s353_s3 = scalar_lea.sflag [#allocation3], %s352_s20  ;;  %s1068_s5 = sshra.s32 %s363_s14, 4  ;;  %s1069_s5 = int_to_ptr.hbm [resolvable:$true] %s1068_s5 }
  0x2c   : > { %s1070_s6 = scalar_lea.hbm %s1069_s5, 8  ;;  %p1072_p9 = pneg %p1335_p8 }
  0x2d   : > { %p1071_p7 = scmp.ne.s32.totalorder %s1069_s5, %s1070_s6  ;;  %s1075_s19 = scalar_lea.hbm %s1447_s1, 16 }
  0x2e   : > { %p1076_p0 = scmp.lt.s32.totalorder %s1069_s5, %s1447_s1  ;;  %p1077_p2 = scmp.lt.s32.totalorder %s1075_s19, %s1070_s6 }
  0x2f   : > { %p1073_p10 = pnand %p1072_p9, %p1071_p7 }
  0x30   : > { %p1078_p6 = por %p1077_p2, %p1076_p0 }
  0x31   : > { %p1074_p11 = pneg %p1073_p10 }
  0x33   : > { %p1079_p5 = pnand %p1078_p6, %p1074_p11 }
  0x35   : > { %1082 = shalt.err (!%p1079_p5)
}
  0x36   : > { %856 = dma.hbm_to_vmem [thread:$0]  (!%p1335_p8), %s363_s14, 128, %s365_s24, %s353_s3  }
  0x37   : > { %373 = sbr.rel (%p1264_p3) target bundleno = 878 (0x36e), region = 56  ;;  %s1352_s20 = sand.u32 (!%p1264_p3), 1, %s1168_s10  }
  0x38   : > { %s795_s21 = sshll.u32 (!%p1264_p3), %s1352_s20, 3  ;;  %s376_s22 = scalar_lea.sflag (!%p1264_p3), [#allocation3], %s1352_s20 }
  0x39   : > { %s1358_s5 = scalar_lea.vmem (!%p1264_p3), [#allocation2], %s795_s21 }
  0x3c   : > { %1143 = dma.done.wait (%p1317_p12), %s376_s22, 128  }
  0x3d   : > { %1145 = vsyncadd (%p1317_p12), %s376_s22, 4294967168 }
  0x3e   : > { %1147 = dma.done.wait (%p75_p1), [#allocation6], 768  }
  0x3f   : > { %1149 = vsyncadd (%p75_p1), [#allocation6], 4294966528 }
  0x40   : > { %1151 = dma.done.wait (%p75_p1), [#allocation9], 1024  }
  0x41   : > { %1153 = vsyncadd (%p75_p1), [#allocation9], 4294966272 }
  0x42   : > { %1155 = dma.done.wait (%p75_p1), [#allocation12], 128  }
  0x43   : > { %1157 = vsyncadd (%p75_p1), [#allocation12], 4294967168  ;;  %p444_p3 = scmp.lt.s32.totalorder %s1259_s16, 1  ;;  %v453_v0 = vld [vmem:[%s1448_s2 + $0x18] sm:$0xff]  ;;  %v452_v1 = vld [vmem:[%s1448_s2 + $0x10] sm:$0xff]  ;;  %vm456_vm0 = vcmask 261120  }
  0x44   : > { %472 = vmatpush.msra.mxu0 %v453_v0  ;;  %v486_v2 = vld [vmem:[#allocation5 + $0x18] sm:$0xff]  ;;  %v450_v4 = vld [vmem:[%s1448_s2] sm:$0xff]  ;;  %v484_v7 = vld [vmem:[#allocation5 + $0x8] sm:$0xff]  ;;  %vm549_vm3 = vcmask 130048   ;;  %s639_s23 = scalar_lea.sflag [#allocation4], %s1352_s20  ;;  %s1118_s25 = scalar_lea.hbm %s1455_s9, 16 }
  0x45   : > { %s445_s3 = scalar_select %p444_p3, %s1259_s16, 1  ;;  %v451_v3 = vld [vmem:[%s1448_s2 + $0x8] sm:$0xff]  ;;  %504 = vmatpush.msra.mxu1 %v486_v2  ;;  %v485_v6 = vld [vmem:[#allocation5 + $0x10] sm:$0xff]  ;;  %v483_v8 = vld [vmem:[#allocation5] sm:$0xff] }
  0x46   : > { %473 = vmatpush.msra.mxu0 %v452_v1  ;;  %v518_v9 = vld [vmem:[%s1450_s4 + $0x18] sm:$0xff]  ;;  %v912_v10 = vld [vmem:[#allocation11] ss:$0 sm:$0xff]  ;;  %v517_v15 = vld [vmem:[%s1450_s4 + $0x10] sm:$0xff] }
  0x47   : > { %s802_s6 = sshll.u32 %s445_s3, 3  ;;  %505 = vmatpush.msra.mxu1 %v485_v6  ;;  %536 = vmatpush.msra.mxu2 %v518_v9  ;;  %v516_v16 = vld [vmem:[%s1450_s4 + $0x8] sm:$0xff]  ;;  %v515_v17 = vld [vmem:[%s1450_s4] sm:$0xff]  ;;  %v546_v23 = vld [vmem:[#allocation7 + $0x8] sm:$0xff]  ;;  %s443_s3 = scalar_lea.vmem [#allocation13], %s795_s21 }
  0x48   : > { %s447_s28 = scalar_lea.vmem %s1446_s0, %s802_s6  ;;  %474 = vmatpush.msra.mxu0 %v451_v3  ;;  %v913_v18 = vld [vmem:[#allocation11 + $0x1] ss:$0 sm:$0xff]  ;;  %567 = vmatpush.msra.mxu3 %v546_v23  ;;  %v545_v24 = vld [vmem:[#allocation7] sm:$0xff]  ;;  %v579_v25 = vld [vmem:[#allocation8 + $0x18] sm:$0xff]  ;;  %s651_s17 = sshll.u32 %s443_s3, 4  ;;  %s652_s17 = int_to_ptr.vmem [resolvable:$true] %s651_s17 }
  0x49   : > { %v448_v5 = vld [vmem:[%s447_s28] sm:$0xff]  ;;  %506 = vmatpush.msra.mxu1 %v484_v7  ;;  %537 = vmatpush.msra.mxu2 %v517_v15  ;;  %v578_v31 = vld [vmem:[#allocation8 + $0x10] sm:$0xff]  ;;  %v577_v32 = vld [vmem:[#allocation8 + $0x8] sm:$0xff] }
  0x4a   : > { %475 = vmatpush.msra.mxu0 %v450_v4  ;;  %568 = vmatpush.msra.mxu3 %v545_v24  ;;  %v914_v26 = vld [vmem:[#allocation11 + $0x2] ss:$0 sm:$0xff]  ;;  %v611_v34 = vld [vmem:[#allocation10 + $0x18] sm:$0xff]  ;;  %v915_v35 = vld [vmem:[#allocation11 + $0x3] ss:$0 sm:$0xff] }
  0x4b   : > { %803 = vmatmul.msk.f32.vlgmr.msra.gmra.mxu0 %vm456_vm0, %v448_v5  ;;  %507 = vmatpush.msra.mxu1 %v483_v8  ;;  %v449_v27 = vld [vmem:[%s1358_s5] sm:$0xff]  ;;  %v610_v40 = vld [vmem:[#allocation10 + $0x10] sm:$0xff]  ;;  %s810_s5 = sshll.u32 %s1259_s16, 3 }
  0x4c   : > { %538 = vmatpush.msra.mxu2 %v516_v16  ;;  %597 = vmatpush.msrb.mxu3 %v579_v25  ;;  %v576_v33 = vld [vmem:[#allocation8] sm:$0xff]  ;;  %v609_v41 = vld [vmem:[#allocation10 + $0x8] sm:$0xff]  ;;  %s649_s22 = scalar_lea.hbm %s1455_s9, %s810_s5 }
  0x4d   : > { %629 = vmatpush.msrb.mxu0 %v611_v34  ;;  %v608_v42 = vld [vmem:[#allocation10] sm:$0xff]  ;;  %s653_s6 = sshll.u32 %s649_s22, 4  ;;  %s654_s6 = int_to_ptr.hbm [resolvable:$true] %s653_s6 }
  0x4e   : > { %539 = vmatpush.msra.mxu2 %v515_v17  ;;  %598 = vmatpush.msrb.mxu3 %v578_v31  ;;  %v916_v43 = vld [vmem:[#allocation11 + $0x4] ss:$0 sm:$0xff]  ;;  %v917_v48 = vld [vmem:[#allocation11 + $0x5] ss:$0 sm:$0xff]  ;;  %s1112_s14 = sshra.s32 %s654_s6, 4  ;;  %s1113_s14 = int_to_ptr.hbm [resolvable:$true] %s1112_s14 }
  0x4f   : > { %630 = vmatpush.msrb.mxu0 %v610_v40  ;;  %s1114_s24 = scalar_lea.hbm %s1113_s14, 8  ;;  %p1119_p8 = scmp.lt.s32.totalorder %s1113_s14, %s1455_s9 }
  0x50   : > { %599 = vmatpush.msrb.mxu3 %v577_v32  ;;  %p1115_p1 = scmp.ne.s32.totalorder %s1113_s14, %s1114_s24  ;;  %p1120_p7 = scmp.lt.s32.totalorder %s1118_s25, %s1114_s24 }
  0x51   : > { %631 = vmatpush.msrb.mxu0 %v609_v41 }
  0x52   : > { %600 = vmatpush.msrb.mxu3 %v576_v33  ;;  %p1116_p5 = pnand %p1115_p1, %p1321_p13  ;;  %p1121_p9 = por %p1120_p7, %p1119_p8 }
  0x53   : > { %632 = vmatpush.msrb.mxu0 %v608_v42 }
  0x54   : > { %p1117_p12 = pneg %p1116_p5 }
  0x56   : > { %p1122_p10 = pnand %p1121_p9, %p1117_p12 }
  0xc8   : > { %v477_v11 = vpop.f32.mrf.mxu0 }
  0xc9   : > { %v478_v12 = vadd.f32 %v912_v10, %v477_v11 }
  0xcb   : > { %v481_v13 = vmul.f32 0.01, %v478_v12  ;;  %vm480_vm1 = vcmp.gt.f32.partialorder %v478_v12, 0.0 }
  0xcd   : > { %v482_v14 = vsel %vm480_vm1, %v478_v12, %v481_v13 }
  0xce   : > { %804 = vmatmul.msk.f32.vlgmr.msra.gmra.mxu1 %vm456_vm0, %v482_v14 }
 0x14b   : > { %v509_v19 = vpop.f32.mrf.mxu1 }
 0x14c   : > { %v510_v20 = vadd.f32 %v913_v18, %v509_v19 }
 0x14e   : > { %v513_v21 = vmul.f32 0.01, %v510_v20  ;;  %vm512_vm2 = vcmp.gt.f32.partialorder %v510_v20, 0.0 }
 0x150   : > { %v514_v22 = vsel %vm512_vm2, %v510_v20, %v513_v21 }
 0x151   : > { %805 = vmatmul.msk.f32.vlgmr.msra.gmra.mxu2 %vm456_vm0, %v514_v22 }
 0x1d4   : > { %v541_v28 = vpop.f32.mrf.mxu2 }
 0x1d5   : > { %v542_v29 = vadd.f32 %v914_v26, %v541_v28 }
 0x1d7   : > { %v544_v30 = vadd.f32 %v542_v29, %v449_v27 }
 0x1d9   : > { %806 = vmatmul.msk.f32.vlgmr.msra.gmra.mxu3 %vm549_vm3, %v544_v30 }
 0x25c   : > { %v570_v36 = vpop.f32.mrf.mxu3 }
 0x25d   : > { %v571_v37 = vadd.f32 %v915_v35, %v570_v36 }
 0x25f   : > { %vm573_vm4 = vcmp.gt.f32.partialorder %v571_v37, 0.0  ;;  %v574_v38 = vmul.f32 0.01, %v571_v37 }
 0x261   : > { %v575_v39 = vsel %vm573_vm4, %v571_v37, %v574_v38 }
 0x262   : > { %807 = vmatmul.msk.f32.vlgmr.msrb.gmra.mxu3 %vm456_vm0, %v575_v39 }
 0x2e5   : > { %v602_v44 = vpop.f32.mrf.mxu3 }
 0x2e6   : > { %v603_v45 = vadd.f32 %v916_v43, %v602_v44 }
 0x2e8   : > { %vm605_vm5 = vcmp.gt.f32.partialorder %v603_v45, 0.0  ;;  %v606_v46 = vmul.f32 0.01, %v603_v45 }
 0x2ea   : > { %v607_v47 = vsel %vm605_vm5, %v603_v45, %v606_v46 }
 0x2eb   : > { %808 = vmatmul.msk.f32.vlgmr.msrb.gmra.mxu0 %vm456_vm0, %v607_v47 }
 0x368   : > { %v634_v49 = vpop.f32.mrf.mxu0 }
 0x369   : > { %v635_v50 = vadd.f32 %v917_v48, %v634_v49 }
 0x36b   : > { %637 = vst [vmem:[%s443_s3] sm:$0xff] %v635_v50 }
 0x36c   : > { %1125 = shalt.err (!%p1122_p10)
}
 0x36d   : > { %835 = dma.vmem_to_hbm [thread:$0]  (%p1321_p13), %s652_s17, 128, %s654_s6, %s639_s23  }
 0x36e PF: > { %s665_s20 = sand.u32 1, %s1164_s30   ;;  %p1468_p11 = scmp.ge.s32.totalorder %s1176_s12, 2 }
 0x36f   : > { %s666_s5 = scalar_lea.sflag [#allocation4], %s665_s20 }
 0x370   : > { %p858_p0 = pnand %p1468_p11, %p1326_p4 }
 0x372   : > { %p859_p2 = pneg %p858_p0 }
 0x374   : > { %1159 = dma.done.wait (%p859_p2), %s666_s5, 128  }
 0x375   : > { %1161 = vsyncadd (%p859_p2), %s666_s5, 4294967168  ;;  %p25_p6 = scmp.ge.s32.totalorder %s1301_s18, 4   ;;  %s1469_s30 = smov %s1168_s10 }
 0x376   : > { %s1470_s10 = smov %s1172_s11  ;;  %s1471_s11 = smov %s1313_s29 }
 0x377   : > { %s1472_s12 = smov %s1301_s18  ;;  %27 = sbr.rel (!%p25_p6) target bundleno = 12 (0xc), region = 124 }
 0x37c   :  { %672 = vsyncpa [#allocation3], 1 }
 0x37d   :  { %674 = vsyncpa [#allocation3 + $0x1], 1 }
 0x37e   :  { %675 = vsyncpa [#allocation6], 1 }
 0x37f   :  { %676 = vsyncpa [#allocation9], 1 }
 0x380   :  { %677 = vsyncpa [#allocation12], 1 }
 0x381   :  { %678 = vsyncpa [#allocation4], 1 }
 0x382   :  { %680 = vsyncpa [#allocation4 + $0x1], 1 }

</bundles_post_ra>
